<compile_context>
chip_gen: v7x
topology: tpu7x:2x2x1
jax: 0.10.0
libtpu: 0.0.40
codegen_flags: <defaults>
</compile_context>

<pallas_src>
import functools

import jax
import jax.numpy as jnp
from jax.experimental import pallas as pl
from jax.experimental.pallas import tpu as pltpu


def _net_kernel(x_ref, a_ref,
                w1s_ref, b1_ref,
                w2s_ref, b2_ref,
                fcw_ref, fcb_ref,
                src_oht_ref, dst_oht_ref,
                score_ref, out_ref, *, num_relations):
    R = num_relations
    x = x_ref[...]                                                   # (N, F)   f32
    N = x.shape[0]
    a = a_ref[...]                                                   # (R*N, N) f32

    # ---- RGCN layer 1: one stacked-adjacency matmul + one stacked-weight matmul ----
    ax = jnp.dot(a, x, preferred_element_type=jnp.float32)           # (R*N, F) = all A_r @ x
    stacked1 = jnp.concatenate(
        [x] + [ax[r * N:(r + 1) * N, :] for r in range(R)], axis=-1)  # (N, (R+1)*F)
    h = jnp.dot(stacked1, w1s_ref[...],
                preferred_element_type=jnp.float32) + b1_ref[...]
    h = jnp.maximum(h, 0.0)

    # ---- RGCN layer 2 ----
    ah = jnp.dot(a, h, preferred_element_type=jnp.float32)           # (R*N, hid)
    stacked2 = jnp.concatenate(
        [h] + [ah[r * N:(r + 1) * N, :] for r in range(R)], axis=-1)  # (N, (R+1)*hid)
    g = jnp.dot(stacked2, w2s_ref[...],
                preferred_element_type=jnp.float32) + b2_ref[...]

    # ---- fc1 (Linear hid -> hid) ----
    out = jnp.dot(g, fcw_ref[...],
                  preferred_element_type=jnp.float32) + fcb_ref[...]  # (N, hid)
    out_ref[...] = out

    # ---- edge scoring: transposed one-hot gathers + sublane reduce -> lane-dense (1, E) ----
    outT = out.T                                                      # (hid, N), cheap XLU transpose
    x_jT = jnp.dot(outT, src_oht_ref[...],
                   preferred_element_type=jnp.float32)                # (hid, E) = out[total[0]].T
    x_iT = jnp.dot(outT, dst_oht_ref[...],
                   preferred_element_type=jnp.float32)                # (hid, E) = out[total[1]].T
    score_ref[...] = jnp.sum(x_iT * x_jT, axis=0, keepdims=True)      # (1, E)


def net_forward(x, adj, params, pos_edge_index, neg_edge_index):
    """Glue (concat / weight packing / one-hot build) in JAX, hot compute in one Pallas kernel."""
    w1, root1, b1, w2, root2, b2, fcw, fcb = params
    R, N, _ = adj.shape
    f_in = x.shape[1]
    hid = root1.shape[1]

    # Stack adjacency and weights once (parameter-side packing).
    a_flat = adj.reshape(R * N, N)                                           # (R*N, N)
    w1s = jnp.concatenate([root1] + [w1[r] for r in range(R)], axis=0)       # ((R+1)*f_in, hid)
    w2s = jnp.concatenate([root2] + [w2[r] for r in range(R)], axis=0)       # ((R+1)*hid, hid)

    # Edge gather one-hots, transposed so the in-kernel gather is a plain matmul
    # and the score output is lane-dense.
    total = jnp.concatenate([pos_edge_index, neg_edge_index], axis=-1)       # (2, E)
    E = total.shape[1]
    node_ids = jnp.arange(N, dtype=jnp.int32)[:, None]                       # (N, 1)
    src_ohT = (node_ids == total[0][None, :].astype(jnp.int32)).astype(jnp.float32)  # (N, E)
    dst_ohT = (node_ids == total[1][None, :].astype(jnp.int32)).astype(jnp.float32)  # (N, E)

    inputs = (x, a_flat, w1s, b1, w2s, b2, fcw, fcb, src_ohT, dst_ohT)

    # Advisory cost estimate so XLA can overlap the tiny custom call with its neighbors.
    flops = 2 * (R * N * N * f_in              # a_flat @ x
                 + N * (R + 1) * f_in * hid    # stacked1 @ w1s
                 + R * N * N * hid             # a_flat @ h
                 + N * (R + 1) * hid * hid     # stacked2 @ w2s
                 + N * hid * hid               # fc1
                 + 2 * hid * N * E)            # edge gathers
    bytes_accessed = int(sum(int(a.size) * a.dtype.itemsize for a in inputs)
                         + (E + N * hid) * 4)

    vmem = lambda: pl.BlockSpec(memory_space=pltpu.MemorySpace.VMEM)
    scores, out = pl.pallas_call(
        functools.partial(_net_kernel, num_relations=R),
        out_shape=(jax.ShapeDtypeStruct((1, E), jnp.float32),
                   jax.ShapeDtypeStruct((N, hid), jnp.float32)),
        in_specs=[vmem() for _ in range(len(inputs))],
        out_specs=(vmem(), vmem()),
        cost_estimate=pl.CostEstimate(flops=flops, transcendentals=0,
                                      bytes_accessed=bytes_accessed),
    )(*inputs)
    return scores[0], out


def build_adjacency(edge_index, edge_type, num_nodes, num_relations):
    """Dense per-relation row-normalized adjacency: A[r, dst, src] = 1/deg_r(dst)."""
    src, dst = edge_index[0], edge_index[1]
    a = jnp.zeros((num_relations, num_nodes, num_nodes), jnp.float32)
    a = a.at[edge_type, dst, src].add(1.0)
    deg = a.sum(axis=-1, keepdims=True)
    return jnp.where(deg > 0, a / deg, 0.0)


def init_params(key, num_features, hidden, num_relations, num_bases):
    ks = jax.random.split(key, 10)
    nrm = lambda k, shp: 0.1 * jax.random.normal(k, shp, jnp.float32)
    # RGCNConv1 (basis decomposition, num_bases=30)
    basis1 = nrm(ks[0], (num_bases, num_features, hidden))
    comp1 = nrm(ks[1], (num_relations, num_bases))
    root1 = nrm(ks[2], (num_features, hidden))
    b1 = nrm(ks[3], (1, hidden))
    # RGCNConv2
    basis2 = nrm(ks[4], (num_bases, hidden, hidden))
    comp2 = nrm(ks[5], (num_relations, num_bases))
    root2 = nrm(ks[6], (hidden, hidden))
    b2 = nrm(ks[7], (1, hidden))
    # fc1
    fcw = nrm(ks[8], (hidden, hidden))
    fcb = nrm(ks[9], (1, hidden))
    # materialize per-relation weights from bases (param setup, done once)
    w1 = jnp.einsum('rb,bio->rio', comp1, basis1)
    w2 = jnp.einsum('rb,bio->rio', comp2, basis2)
    return (w1, root1, b1, w2, root2, b2, fcw, fcb)


if __name__ == "__main__":
    key = jax.random.PRNGKey(0)
    N, F_IN, HID, R, NB = 32, 16, 16, 4, 30
    E_TRAIN, E_POS, E_NEG = 48, 8, 8

    k_x, k_p, k_e1, k_e2, k_e3, k_t = jax.random.split(key, 6)
    x = jax.random.normal(k_x, (N, F_IN), jnp.float32)                  # data.x
    train_edge_index = jax.random.randint(k_e1, (2, E_TRAIN), 0, N, jnp.int32)
    edge_type = jax.random.randint(k_t, (E_TRAIN,), 0, R, jnp.int32)    # data.edge_type
    pos_edge_index = jax.random.randint(k_e2, (2, E_POS), 0, N, jnp.int32)
    neg_edge_index = jax.random.randint(k_e3, (2, E_NEG), 0, N, jnp.int32)

    params = init_params(k_p, F_IN, HID, R, NB)
    adj = build_adjacency(train_edge_index, edge_type, N, R)

    scores, out = net_forward(x, adj, params, pos_edge_index, neg_edge_index)
    jax.block_until_ready((scores, out))

    # pure-JAX reference (original per-relation formulation, sanity check)
    def ref_forward():
        w1, root1, b1, w2, root2, b2, fcw, fcb = params
        h = x @ root1 + b1
        for r in range(R):
            h = h + (adj[r] @ x) @ w1[r]
        h = jnp.maximum(h, 0.0)
        g = h @ root2 + b2
        for r in range(R):
            g = g + (adj[r] @ h) @ w2[r]
        o = g @ fcw + fcb
        total = jnp.concatenate([pos_edge_index, neg_edge_index], axis=-1)
        x_j = o[total[0]]
        x_i = o[total[1]]
        return jnp.sum(x_i * x_j, axis=-1), o

    ref_scores, ref_out = ref_forward()
    assert scores.shape == (E_POS + E_NEG,) and out.shape == (N, HID)
    assert jnp.allclose(out, ref_out, rtol=2e-3, atol=2e-3)
    assert jnp.allclose(scores, ref_scores, rtol=2e-3, atol=2e-3)
    print("KERNEL_OK")
</pallas_src>

<mosaic_0001>
module attributes {stable_mosaic.version = 11 : i64} {
  func.func @_net_kernel(%arg0: memref<32x16xf32, #tpu.memory_space<vmem>>, %arg1: memref<128x32xf32, #tpu.memory_space<vmem>>, %arg2: memref<80x16xf32, #tpu.memory_space<vmem>>, %arg3: memref<1x16xf32, #tpu.memory_space<vmem>>, %arg4: memref<80x16xf32, #tpu.memory_space<vmem>>, %arg5: memref<1x16xf32, #tpu.memory_space<vmem>>, %arg6: memref<16x16xf32, #tpu.memory_space<vmem>>, %arg7: memref<1x16xf32, #tpu.memory_space<vmem>>, %arg8: memref<32x16xf32, #tpu.memory_space<vmem>>, %arg9: memref<32x16xf32, #tpu.memory_space<vmem>>, %arg10: memref<1x16xf32, #tpu.memory_space<vmem>>, %arg11: memref<32x16xf32, #tpu.memory_space<vmem>>) attributes {dimension_semantics = [], scalar_prefetch = 0 : i64, scratch_operands = 0 : i64, tpu.core_type = #tpu.core_type<tc>} {
    %c0 = arith.constant 0 : index
    %c0_0 = arith.constant 0 : index
    %0 = vector.load %arg0[%c0, %c0_0] : memref<32x16xf32, #tpu.memory_space<vmem>>, vector<32x16xf32>
    %c0_1 = arith.constant 0 : index
    %c0_2 = arith.constant 0 : index
    %1 = vector.load %arg1[%c0_1, %c0_2] : memref<128x32xf32, #tpu.memory_space<vmem>>, vector<128x32xf32>
    %cst = arith.constant dense<0.000000e+00> : vector<128x16xf32>
    %2 = tpu.matmul %1, %0, %cst {dimension_numbers = #tpu.dot_dimension_numbers<[1], [0], [0], [1], [0, 0, 1, 1], [], []>} : vector<128x32xf32>, vector<32x16xf32>, vector<128x16xf32> -> vector<128x16xf32>
    %3 = vector.extract_strided_slice %2 {offsets = [0, 0], sizes = [32, 16], strides = [1, 1]} : vector<128x16xf32> to vector<32x16xf32>
    %4 = vector.extract_strided_slice %2 {offsets = [32, 0], sizes = [32, 16], strides = [1, 1]} : vector<128x16xf32> to vector<32x16xf32>
    %5 = vector.extract_strided_slice %2 {offsets = [64, 0], sizes = [32, 16], strides = [1, 1]} : vector<128x16xf32> to vector<32x16xf32>
    %6 = vector.extract_strided_slice %2 {offsets = [96, 0], sizes = [32, 16], strides = [1, 1]} : vector<128x16xf32> to vector<32x16xf32>
    %7 = tpu.concatenate %0, %3, %4, %5, %6 in 1 : vector<32x16xf32>, vector<32x16xf32>, vector<32x16xf32>, vector<32x16xf32>, vector<32x16xf32> -> vector<32x80xf32>
    %c0_3 = arith.constant 0 : index
    %c0_4 = arith.constant 0 : index
    %8 = vector.load %arg2[%c0_3, %c0_4] : memref<80x16xf32, #tpu.memory_space<vmem>>, vector<80x16xf32>
    %cst_5 = arith.constant dense<0.000000e+00> : vector<32x16xf32>
    %9 = tpu.matmul %7, %8, %cst_5 {dimension_numbers = #tpu.dot_dimension_numbers<[1], [0], [0], [1], [0, 0, 1, 1], [], []>} : vector<32x80xf32>, vector<80x16xf32>, vector<32x16xf32> -> vector<32x16xf32>
    %c0_6 = arith.constant 0 : index
    %c0_7 = arith.constant 0 : index
    %10 = vector.load %arg3[%c0_6, %c0_7] : memref<1x16xf32, #tpu.memory_space<vmem>>, vector<1x16xf32>
    %11 = vector.broadcast %10 : vector<1x16xf32> to vector<32x16xf32>
    %12 = arith.addf %9, %11 : vector<32x16xf32>
    %cst_8 = arith.constant 0.000000e+00 : f32
    %13 = vector.broadcast %cst_8 : f32 to vector<32x16xf32>
    %14 = arith.maximumf %12, %13 : vector<32x16xf32>
    %cst_9 = arith.constant dense<0.000000e+00> : vector<128x16xf32>
    %15 = tpu.matmul %1, %14, %cst_9 {dimension_numbers = #tpu.dot_dimension_numbers<[1], [0], [0], [1], [0, 0, 1, 1], [], []>} : vector<128x32xf32>, vector<32x16xf32>, vector<128x16xf32> -> vector<128x16xf32>
    %16 = vector.extract_strided_slice %15 {offsets = [0, 0], sizes = [32, 16], strides = [1, 1]} : vector<128x16xf32> to vector<32x16xf32>
    %17 = vector.extract_strided_slice %15 {offsets = [32, 0], sizes = [32, 16], strides = [1, 1]} : vector<128x16xf32> to vector<32x16xf32>
    %18 = vector.extract_strided_slice %15 {offsets = [64, 0], sizes = [32, 16], strides = [1, 1]} : vector<128x16xf32> to vector<32x16xf32>
    %19 = vector.extract_strided_slice %15 {offsets = [96, 0], sizes = [32, 16], strides = [1, 1]} : vector<128x16xf32> to vector<32x16xf32>
    %20 = tpu.concatenate %14, %16, %17, %18, %19 in 1 : vector<32x16xf32>, vector<32x16xf32>, vector<32x16xf32>, vector<32x16xf32>, vector<32x16xf32> -> vector<32x80xf32>
    %c0_10 = arith.constant 0 : index
    %c0_11 = arith.constant 0 : index
    %21 = vector.load %arg4[%c0_10, %c0_11] : memref<80x16xf32, #tpu.memory_space<vmem>>, vector<80x16xf32>
    %cst_12 = arith.constant dense<0.000000e+00> : vector<32x16xf32>
    %22 = tpu.matmul %20, %21, %cst_12 {dimension_numbers = #tpu.dot_dimension_numbers<[1], [0], [0], [1], [0, 0, 1, 1], [], []>} : vector<32x80xf32>, vector<80x16xf32>, vector<32x16xf32> -> vector<32x16xf32>
    %c0_13 = arith.constant 0 : index
    %c0_14 = arith.constant 0 : index
    %23 = vector.load %arg5[%c0_13, %c0_14] : memref<1x16xf32, #tpu.memory_space<vmem>>, vector<1x16xf32>
    %24 = vector.broadcast %23 : vector<1x16xf32> to vector<32x16xf32>
    %25 = arith.addf %22, %24 : vector<32x16xf32>
    %c0_15 = arith.constant 0 : index
    %c0_16 = arith.constant 0 : index
    %26 = vector.load %arg6[%c0_15, %c0_16] : memref<16x16xf32, #tpu.memory_space<vmem>>, vector<16x16xf32>
    %cst_17 = arith.constant dense<0.000000e+00> : vector<32x16xf32>
    %27 = tpu.matmul %25, %26, %cst_17 {dimension_numbers = #tpu.dot_dimension_numbers<[1], [0], [0], [1], [0, 0, 1, 1], [], []>} : vector<32x16xf32>, vector<16x16xf32>, vector<32x16xf32> -> vector<32x16xf32>
    %c0_18 = arith.constant 0 : index
    %c0_19 = arith.constant 0 : index
    %28 = vector.load %arg7[%c0_18, %c0_19] : memref<1x16xf32, #tpu.memory_space<vmem>>, vector<1x16xf32>
    %29 = vector.broadcast %28 : vector<1x16xf32> to vector<32x16xf32>
    %30 = arith.addf %27, %29 : vector<32x16xf32>
    %c0_20 = arith.constant 0 : index
    %c0_21 = arith.constant 0 : index
    %31 = vector.load %arg11[%c0_20, %c0_21] : memref<32x16xf32, #tpu.memory_space<vmem>>, vector<32x16xf32>
    tpu.vector_store %arg11[%c0_20, %c0_21], %30 {strides = array<i32>} : memref<32x16xf32, #tpu.memory_space<vmem>>, vector<32x16xf32>,
    %32 = tpu.transpose %30, [1, 0] : vector<32x16xf32> -> vector<16x32xf32>
    %c0_22 = arith.constant 0 : index
    %c0_23 = arith.constant 0 : index
    %33 = vector.load %arg8[%c0_22, %c0_23] : memref<32x16xf32, #tpu.memory_space<vmem>>, vector<32x16xf32>
    %cst_24 = arith.constant dense<0.000000e+00> : vector<16x16xf32>
    %34 = tpu.matmul %32, %33, %cst_24 {dimension_numbers = #tpu.dot_dimension_numbers<[1], [0], [0], [1], [0, 0, 1, 1], [], []>} : vector<16x32xf32>, vector<32x16xf32>, vector<16x16xf32> -> vector<16x16xf32>
    %c0_25 = arith.constant 0 : index
    %c0_26 = arith.constant 0 : index
    %35 = vector.load %arg9[%c0_25, %c0_26] : memref<32x16xf32, #tpu.memory_space<vmem>>, vector<32x16xf32>
    %cst_27 = arith.constant dense<0.000000e+00> : vector<16x16xf32>
    %36 = tpu.matmul %32, %35, %cst_27 {dimension_numbers = #tpu.dot_dimension_numbers<[1], [0], [0], [1], [0, 0, 1, 1], [], []>} : vector<16x32xf32>, vector<32x16xf32>, vector<16x16xf32> -> vector<16x16xf32>
    %37 = arith.mulf %36, %34 : vector<16x16xf32>
    %cst_28 = arith.constant dense<0.000000e+00> : vector<16xf32>
    %38 = vector.multi_reduction <add>, %37, %cst_28 [0] : vector<16x16xf32> to vector<16xf32>
    %39 = vector.shape_cast %38 : vector<16xf32> to vector<1x16xf32>
    %c0_29 = arith.constant 0 : index
    %c0_30 = arith.constant 0 : index
    %40 = vector.load %arg10[%c0_29, %c0_30] : memref<1x16xf32, #tpu.memory_space<vmem>>, vector<1x16xf32>
    tpu.vector_store %arg10[%c0_29, %c0_30], %39 {strides = array<i32>} : memref<1x16xf32, #tpu.memory_space<vmem>>, vector<1x16xf32>,
    return
  }
}

</mosaic_0001>

<bundles_post_ra>
// kernel: tpu_custom_call.1
= control target key start
LH: loop header
LB: loop body
LE: loop exit
PB: predicated region body
PF: predicated region fallthrough
CT: control target
= control target key end

     0   :  { %vm58_vm0 = vcmask 261120   ;;  %s1995_s0 = inlined_call_operand.vmem [shape: f32[32,16], index: 0, kind: input, shape index: {}]   ;;  %s1996_s1 = inlined_call_operand.vmem [shape: f32[128,32], index: 1, kind: input, shape index: {}]   ;;  %s1997_s2 = inlined_call_operand.vmem [shape: f32[80,16], index: 2, kind: input, shape index: {}]   ;;  %s1998_s3 = inlined_call_operand.vmem [shape: f32[1,16], index: 3, kind: input, shape index: {}]   ;;  %s1999_s4 = inlined_call_operand.vmem [shape: f32[80,16], index: 4, kind: input, shape index: {}]   ;;  %s2000_s5 = inlined_call_operand.vmem [shape: f32[1,16], index: 5, kind: input, shape index: {}]   ;;  %s2001_s6 = inlined_call_operand.vmem [shape: f32[16,16], index: 6, kind: input, shape index: {}]   ;;  %s2002_s7 = inlined_call_operand.vmem [shape: f32[1,16], index: 7, kind: input, shape index: {}]   ;;  %s2003_s8 = inlined_call_operand.vmem [shape: f32[32,16], index: 8, kind: input, shape index: {}]   ;;  %s2004_s9 = inlined_call_operand.vmem [shape: f32[32,16], index: 9, kind: input, shape index: {}]   ;;  %s2005_s10 = inlined_call_operand.hbm [shape: f32[1,16], index: 10, kind: output, shape index: {0}]   ;;  %s2006_s11 = inlined_call_operand.vmem [shape: f32[32,16], index: 11, kind: output, shape index: {1}]  }
   0x1   :  { %v1589_v0 = vld [vmem:[%s1995_s0] sm:$0xff]  ;;  %v1594_v1 = vld [vmem:[%s1995_s0 + $0x8] sm:$0xff]  ;;  %v1599_v2 = vld [vmem:[%s1995_s0 + $0x10] sm:$0xff] }
   0x2   :  { %v1415_v3 = vpack.c.bf16 %v1594_v1, %v1589_v0  ;;  %v1606_v4 = vld [vmem:[%s1995_s0 + $0x18] sm:$0xff]  ;;  %v1611_v5 = vld [vmem:[%s1996_s1] sm:$0xff] }
   0x3   :  { %v1419_v6 = vpack.c.bf16 %v1606_v4, %v1599_v2  ;;  %1275 = vmatprep.mubr.msk.f32.mxu0 %vm58_vm0, %v1611_v5 }
   0x4   :  { %1416 = vmatprep.subr.bf16.mxu0 %v1415_v3 }
   0x5   :  { %1418 = vmatpush3.bf16.msra.mxu0 %v1415_v3 }
   0x6   :  { %1420 = vmatprep.subr.bf16.mxu0 %v1419_v6 }
   0x7   :  { %17 = vsyncpa [#allocation3], 0  ;;  %v1620_v7 = vld [vmem:[%s1996_s1 + $0x8] sm:$0xff]  ;;  %v1625_v8 = vld [vmem:[%s1996_s1 + $0x10] sm:$0xff]  ;;  %s1521_s24 = smov 16   ;;  %s1522_s17 = smov 32  }
   0x8   :  { %v1634_v9 = vld [vmem:[%s1996_s1 + $0x18] sm:$0xff]  ;;  %v1639_v10 = vld [vmem:[%s1996_s1 + $0x20] sm:$0xff]  ;;  %v1648_v11 = vld [vmem:[%s1996_s1 + $0x28] sm:$0xff]  ;;  %s1523_s18 = smov 48   ;;  %vm316_vm1 = vcmask 130048   ;;  %vm325_vm2 = vcmask 392192  }
   0x9   :  { %1422 = vmatpush3.bf16.msra.mxu0 %v1419_v6  ;;  %v1653_v12 = vld [vmem:[%s1996_s1 + $0x30] sm:$0xff]  ;;  %v1662_v13 = vld [vmem:[%s1996_s1 + $0x38] sm:$0xff]  ;;  %v1667_v14 = vld [vmem:[%s1996_s1 + $0x40] sm:$0xff]  ;;  %vm330_vm3 = vcmask 523264   ;;  %vm352_vm4 = vcmask 654336   ;;  %vm1110_vm5 = vcmask 122880  }
   0xa   :  { %v1676_v15 = vld [vmem:[%s1996_s1 + $0x48] sm:$0xff]  ;;  %v1681_v16 = vld [vmem:[%s1996_s1 + $0x50] sm:$0xff]  ;;  %v1690_v17 = vld [vmem:[%s1996_s1 + $0x58] sm:$0xff] }
   0xb   :  { %v1695_v18 = vld [vmem:[%s1996_s1 + $0x60] sm:$0xff]  ;;  %v1704_v19 = vld [vmem:[%s1996_s1 + $0x68] sm:$0xff]  ;;  %v1709_v20 = vld [vmem:[%s1996_s1 + $0x70] sm:$0xff] }
   0xc   :  { %1276 = vmatmul.mubr.msk.f32.vlgmr.msra.gmra.mrb[0].mxu0 %vm58_vm0, %v1620_v7  ;;  %v1718_v21 = vld [vmem:[%s1996_s1 + $0x78] sm:$0xff]  ;;  %v335_v22 = vld [vmem:[%s1997_s2] sm:$0xff]  ;;  %v336_v23 = vld [vmem:[%s1997_s2 + $0x8] sm:$0xff] }
   0xd   :  { %1278 = vmatprep.mubr.msk.f32.mxu0 %vm58_vm0, %v1625_v8  ;;  %v1423_v24 = vpack.c.bf16 %v336_v23, %v335_v22  ;;  %v337_v26 = vld [vmem:[%s1997_s2 + $0x10] sm:$0xff]  ;;  %v338_v27 = vld [vmem:[%s1997_s2 + $0x18] sm:$0xff]  ;;  %v339_v31 = vld [vmem:[%s1997_s2 + $0x20] sm:$0xff] }
   0xe   :  { %v1427_v29 = vpack.c.bf16 %v338_v27, %v337_v26  ;;  %v340_v32 = vld [vmem:[%s1997_s2 + $0x28] sm:$0xff]  ;;  %v341_v36 = vld [vmem:[%s1997_s2 + $0x30] sm:$0xff]  ;;  %v342_v37 = vld [vmem:[%s1997_s2 + $0x38] sm:$0xff] }
   0xf   :  { %1424 = vmatprep.subr.bf16.mxu1 %v1423_v24  ;;  %v1431_v34 = vpack.c.bf16 %v340_v32, %v339_v31  ;;  %v1435_v39 = vpack.c.bf16 %v342_v37, %v341_v36  ;;  %v343_v41 = vld [vmem:[%s1997_s2 + $0x40] sm:$0xff]  ;;  %v344_v42 = vld [vmem:[%s1997_s2 + $0x48] sm:$0xff]  ;;  %s1524_s2 = smov 64  }
  0x10   :  { %1279 = vmatmul.mubr.msk.f32.gmra.mrb[2].mxu0 %vm58_vm0, %v1634_v9  ;;  %1426 = vmatpush3.bf16.msra.mxu1 %v1423_v24  ;;  %v1439_v44 = vpack.c.bf16 %v344_v42, %v343_v41 }
  0x11   :  { %1281 = vmatprep.mubr.msk.f32.mxu0 %vm58_vm0, %v1639_v10  ;;  %1428 = vmatprep.subr.bf16.mxu1 %v1427_v29 }
  0x14   :  { %1282 = vmatmul.mubr.msk.f32.gmra.mrb[4].mxu0 %vm58_vm0, %v1648_v11  ;;  %1430 = vmatpush3.bf16.msra.mxu1 %v1427_v29 }
  0x15   :  { %1284 = vmatprep.mubr.msk.f32.mxu0 %vm58_vm0, %v1653_v12  ;;  %1432 = vmatprep.subr.bf16.mxu1 %v1431_v34 }
  0x18   :  { %1285 = vmatmul.mubr.msk.f32.gmra.mrb[6].mxu0 %vm58_vm0, %v1662_v13  ;;  %1434 = vmatpush3.bf16.msra.mxu1 %v1431_v34 }
  0x19   :  { %1287 = vmatprep.mubr.msk.f32.mxu0 %vm58_vm0, %v1667_v14  ;;  %1436 = vmatprep.subr.bf16.mxu1 %v1435_v39 }
  0x1c   :  { %1288 = vmatmul.mubr.msk.f32.gmra.mrb[8].mxu0 %vm58_vm0, %v1676_v15  ;;  %1438 = vmatpush3.bf16.msra.mxu1 %v1435_v39 }
  0x1d   :  { %1290 = vmatprep.mubr.msk.f32.mxu0 %vm58_vm0, %v1681_v16  ;;  %1440 = vmatprep.subr.bf16.mxu1 %v1439_v44 }
  0x20   :  { %1291 = vmatmul.mubr.msk.f32.gmra.mrb[10].mxu0 %vm58_vm0, %v1690_v17  ;;  %1442 = vmatpush3.bf16.msra.mxu1 %v1439_v44 }
  0x21   :  { %1293 = vmatprep.mubr.msk.f32.mxu0 %vm58_vm0, %v1695_v18 }
  0x24   :  { %1294 = vmatmul.mubr.msk.f32.gmra.mrb[12].mxu0 %vm58_vm0, %v1704_v19 }
  0x25   :  { %1296 = vmatprep.mubr.msk.f32.mxu0 %vm58_vm0, %v1709_v20 }
  0x28   :  { %1297 = vmatmul.mubr.msk.f32.gmra.mrb[14].mxu0 %vm58_vm0, %v1718_v21 }
  0xdf   :  { %v1277_v25 = vpop.f32.mrb[0].mxu0 }
  0xe0   :  { %258 = vrot.lane.b32.xlu0 %v1277_v25, %s1521_s24  ;;  %v173_v28 = vpop.f32.mrb[1].mxu0 }
  0xe3   :  { %v1280_v30 = vpop.f32.mrb[2].mxu0 }
  0xe4   :  { %256 = vrot.lane.b32.xlu0 %v173_v28, %s1521_s24  ;;  %262 = vrot.lane.b32.xlu1 %v1280_v30, %s1521_s24  ;;  %v183_v33 = vpop.f32.mrb[3].mxu0 }
  0xe7   :  { %v1283_v35 = vpop.f32.mrb[4].mxu0 }
  0xe8   :  { %260 = vrot.lane.b32.xlu1 %v183_v33, %s1521_s24  ;;  %v193_v38 = vpop.f32.mrb[5].mxu0 }
  0xeb   :  { %v1286_v40 = vpop.f32.mrb[6].mxu0 }
  0xec   :  { %274 = vrot.lane.b32.xlu1 %v1283_v35, %s1522_s17  ;;  %v203_v43 = vpop.f32.mrb[7].mxu0 }
  0xed   :  { %276 = vrot.lane.b32.xlu0 %v203_v43, %s1522_s17 }
  0xef   :  { %v1289_v45 = vpop.f32.mrb[8].mxu0 }
  0xf0   :  { %272 = vrot.lane.b32.xlu1 %v193_v38, %s1522_s17  ;;  %v213_v46 = vpop.f32.mrb[9].mxu0 }
  0xf1   :  { %288 = vrot.lane.b32.xlu0 %v213_v46, %s1523_s18 }
  0xf3   :  { %v1292_v47 = vpop.f32.mrb[10].mxu0 }
  0xf4   :  { %278 = vrot.lane.b32.xlu1 %v1286_v40, %s1522_s17  ;;  %v223_v48 = vpop.f32.mrb[11].mxu0 }
  0xf5   :  { %292 = vrot.lane.b32.xlu0 %v223_v48, %s1523_s18 }
  0xf7   :  { %v1295_v49 = vpop.f32.mrb[12].mxu0 }
  0xf8   :  { %290 = vrot.lane.b32.xlu1 %v1289_v45, %s1523_s18  ;;  %v233_v50 = vpop.f32.mrb[13].mxu0 }
  0xf9   :  { %306 = vrot.lane.b32.xlu0 %v1295_v49, %s1524_s2 }
  0xfb   :  { %v1298_v51 = vpop.f32.mrb[14].mxu0 }
  0xfc   :  { %294 = vrot.lane.b32.xlu1 %v1292_v47, %s1523_s18  ;;  %v243_v52 = vpop.f32.mrb[15].mxu0 }
  0xfd   :  { %304 = vrot.lane.b32.xlu0 %v233_v50, %s1524_s2 }
 0x100   :  { %310 = vrot.lane.b32.xlu1 %v1298_v51, %s1524_s2 }
 0x101   :  { %308 = vrot.lane.b32.xlu0 %v243_v52, %s1524_s2 }
 0x152   :  { %v259_v53 = vpop.permute.xlu0 %258 }
 0x153   :  { %v318_v22 = vsel %vm316_vm1, %v1594_v1, %v259_v53 }
 0x156   :  { %v263_v54 = vpop.permute.xlu1 %262  ;;  %v257_v56 = vpop.permute.xlu0 %256 }
 0x157   :  { %v317_v3 = vsel %vm316_vm1, %v1589_v0, %v257_v56  ;;  %v320_v30 = vsel %vm316_vm1, %v1606_v4, %v263_v54  ;;  %v1146_v4 = vld [vmem:[%s1998_s3] ss:$0 sm:$0xff]  ;;  %v688_v56 = vld [vmem:[%s1999_s4 + $0x48] sm:$0xff] }
 0x15a   :  { %v261_v55 = vpop.permute.xlu1 %260 }
 0x15b   :  { %v319_v0 = vsel %vm316_vm1, %v1599_v2, %v261_v55  ;;  %v687_v55 = vld [vmem:[%s1999_s4 + $0x40] sm:$0xff] }
 0x15e   :  { %v275_v57 = vpop.permute.xlu1 %274 }
 0x15f   :  { %v277_v58 = vpop.permute.xlu0 %276  ;;  %v322_v24 = vsel %vm58_vm0, %v318_v22, %v275_v57 }
 0x160   :  { %v323_v31 = vsel %vm58_vm0, %v319_v0, %v277_v58  ;;  %v1467_v58 = vpack.c.bf16 %v688_v56, %v687_v55  ;;  %v1172_v56 = vld [vmem:[%s2002_s7] ss:$0 sm:$0xff] }
 0x162   :  { %v273_v59 = vpop.permute.xlu1 %272 }
 0x163   :  { %v289_v60 = vpop.permute.xlu0 %288  ;;  %v321_v23 = vsel %vm58_vm0, %v317_v3, %v273_v59  ;;  %v794_v3 = vld [vmem:[%s2001_s6 + $0x8] sm:$0xff] }
 0x164   :  { %v326_v27 = vsel %vm325_vm2, %v321_v23, %v289_v60 }
 0x166   :  { %v279_v61 = vpop.permute.xlu1 %278 }
 0x167   :  { %v293_v62 = vpop.permute.xlu0 %292  ;;  %v324_v33 = vsel %vm58_vm0, %v320_v30, %v279_v61 }
 0x168   :  { %v328_v34 = vsel %vm325_vm2, %v323_v31, %v293_v62 }
 0x16a   :  { %v291_v63 = vpop.permute.xlu1 %290 }
 0x16b   :  { %v307_v6 = vpop.permute.xlu0 %306  ;;  %v327_v25 = vsel %vm325_vm2, %v322_v24, %v291_v63  ;;  %v793_v63 = vld [vmem:[%s2001_s6] sm:$0xff] }
 0x16c   :  { %v332_v1 = vsel %vm330_vm3, %v327_v25, %v307_v6  ;;  %v1471_v22 = vpack.c.bf16 %v794_v3, %v793_v63 }
 0x16e   :  { %v295_v26 = vpop.permute.xlu1 %294 }
 0x16f   :  { %v305_v28 = vpop.permute.xlu0 %304  ;;  %v329_v36 = vsel %vm325_vm2, %v324_v33, %v295_v26 }
 0x170   :  { %v331_v29 = vsel %vm330_vm3, %v326_v27, %v305_v28 }
 0x171   :  { %1319 = vmatprep.mubr.msk.f32.mxu1 %vm352_vm4, %v331_v29 }
 0x172   :  { %1320 = vmatmul.mubr.msk.f32.vlgmr.msra.gmra.mrb[0].mxu1 %vm352_vm4, %v332_v1  ;;  %v311_v32 = vpop.permute.xlu1 %310 }
 0x173   :  { %v309_v35 = vpop.permute.xlu0 %308  ;;  %v334_v37 = vsel %vm330_vm3, %v329_v36, %v311_v32 }
 0x174   :  { %v333_v2 = vsel %vm330_vm3, %v328_v34, %v309_v35 }
 0x175   :  { %1322 = vmatprep.mubr.msk.f32.mxu1 %vm352_vm4, %v333_v2 }
 0x176   :  { %1323 = vmatmul.mubr.msk.f32.gmra.mrb[2].mxu1 %vm352_vm4, %v334_v37 }
 0x177   :  { %1333 = vmatprep.mubr.msk.f32.mxu1 %vm58_vm0, %v1611_v5 }
 0x245   :  { %v1321_v38 = vpop.f32.mrb[0].mxu1 }
 0x246   :  { %v1797_v39 = vadd.f32 %v1321_v38, %v1146_v4  ;;  %v431_v40 = vpop.f32.mrb[1].mxu1 }
 0x247   :  { %v1799_v41 = vadd.f32 %v1146_v4, %v431_v40 }
 0x248   :  { %v451_v42 = vmax.f32 %v1797_v39, 0.0 }
 0x249   :  { %v450_v43 = vmax.f32 %v1799_v41, 0.0  ;;  %v1324_v44 = vpop.f32.mrb[2].mxu1 }
 0x24a   :  { %v1803_v45 = vadd.f32 %v1324_v44, %v1146_v4  ;;  %v441_v46 = vpop.f32.mrb[3].mxu1 }
 0x24b   :  { %v1443_v5 = vpack.c.bf16 %v451_v42, %v450_v43  ;;  %v1809_v47 = vadd.f32 %v1146_v4, %v441_v46 }
 0x24c   :  { %v453_v48 = vmax.f32 %v1803_v45, 0.0  ;;  %v1167_v45 = vld [vmem:[%s2000_s5] ss:$0 sm:$0xff] }
 0x24d   :  { %v452_v49 = vmax.f32 %v1809_v47, 0.0  ;;  %1444 = vmatprep.subr.bf16.mxu1 %v1443_v5 }
 0x24e   :  { %1446 = vmatpush3.bf16.msra.mxu1 %v1443_v5 }
 0x24f   :  { %v1447_v50 = vpack.c.bf16 %v453_v48, %v452_v49 }
 0x251   :  { %1448 = vmatprep.subr.bf16.mxu1 %v1447_v50 }
 0x252   :  { %1450 = vmatpush3.bf16.msra.mxu1 %v1447_v50 }
 0x255   :  { %1334 = vmatmul.mubr.msk.f32.vlgmr.msra.gmra.mrb[4].mxu1 %vm58_vm0, %v1620_v7  ;;  %v679_v7 = vld [vmem:[%s1999_s4] sm:$0xff] }
 0x256   :  { %1336 = vmatprep.mubr.msk.f32.mxu1 %vm58_vm0, %v1625_v8  ;;  %v680_v8 = vld [vmem:[%s1999_s4 + $0x8] sm:$0xff] }
 0x259   :  { %1337 = vmatmul.mubr.msk.f32.gmra.mrb[6].mxu1 %vm58_vm0, %v1634_v9  ;;  %v1451_v9 = vpack.c.bf16 %v680_v8, %v679_v7 }
 0x25a   :  { %1339 = vmatprep.mubr.msk.f32.mxu1 %vm58_vm0, %v1639_v10  ;;  %v681_v10 = vld [vmem:[%s1999_s4 + $0x10] sm:$0xff] }
 0x25b   :  { %1452 = vmatprep.subr.bf16.mxu0 %v1451_v9 }
 0x25c   :  { %1454 = vmatpush3.bf16.msra.mxu0 %v1451_v9 }
 0x25d   :  { %1340 = vmatmul.mubr.msk.f32.gmra.mrb[8].mxu1 %vm58_vm0, %v1648_v11  ;;  %v682_v11 = vld [vmem:[%s1999_s4 + $0x18] sm:$0xff] }
 0x25e   :  { %1342 = vmatprep.mubr.msk.f32.mxu1 %vm58_vm0, %v1653_v12  ;;  %v1455_v12 = vpack.c.bf16 %v682_v11, %v681_v10 }
 0x260   :  { %1456 = vmatprep.subr.bf16.mxu0 %v1455_v12 }
 0x261   :  { %1343 = vmatmul.mubr.msk.f32.gmra.mrb[10].mxu1 %vm58_vm0, %v1662_v13  ;;  %1458 = vmatpush3.bf16.msra.mxu0 %v1455_v12 }
 0x262   :  { %1345 = vmatprep.mubr.msk.f32.mxu1 %vm58_vm0, %v1667_v14  ;;  %v683_v14 = vld [vmem:[%s1999_s4 + $0x20] sm:$0xff] }
 0x265   :  { %1346 = vmatmul.mubr.msk.f32.gmra.mrb[12].mxu1 %vm58_vm0, %v1676_v15  ;;  %v684_v15 = vld [vmem:[%s1999_s4 + $0x28] sm:$0xff] }
 0x266   :  { %1348 = vmatprep.mubr.msk.f32.mxu1 %vm58_vm0, %v1681_v16 }
 0x269   :  { %1349 = vmatmul.mubr.msk.f32.gmra.mrb[14].mxu1 %vm58_vm0, %v1690_v17  ;;  %v1459_v17 = vpack.c.bf16 %v684_v15, %v683_v14 }
 0x26a   :  { %1351 = vmatprep.mubr.msk.f32.mxu1 %vm58_vm0, %v1695_v18 }
 0x26b   :  { %1460 = vmatprep.subr.bf16.mxu0 %v1459_v17 }
 0x26c   :  { %1462 = vmatpush3.bf16.msra.mxu0 %v1459_v17 }
 0x26d   :  { %1352 = vmatmul.mubr.msk.f32.gmra.mrb[16].mxu1 %vm58_vm0, %v1704_v19 }
 0x26e   :  { %1354 = vmatprep.mubr.msk.f32.mxu1 %vm58_vm0, %v1709_v20  ;;  %v685_v20 = vld [vmem:[%s1999_s4 + $0x30] sm:$0xff] }
 0x271   :  { %1355 = vmatmul.mubr.msk.f32.gmra.mrb[18].mxu1 %vm58_vm0, %v1718_v21  ;;  %v686_v21 = vld [vmem:[%s1999_s4 + $0x38] sm:$0xff] }
 0x272   :  { %v1463_v51 = vpack.c.bf16 %v686_v21, %v685_v20  ;;  %v1022_v20 = vld [vmem:[%s2004_s9 + $0x10] sm:$0xff] }
 0x274   :  { %1464 = vmatprep.subr.bf16.mxu0 %v1463_v51 }
 0x275   :  { %1466 = vmatpush3.bf16.msra.mxu0 %v1463_v51  ;;  %v1023_v51 = vld [vmem:[%s2004_s9 + $0x18] sm:$0xff] }
 0x276   :  { %1468 = vmatprep.subr.bf16.mxu0 %v1467_v58 }
 0x279   :  { %1470 = vmatpush3.bf16.msra.mxu0 %v1467_v58 }
 0x27a   :  { %1472 = vmatprep.subr.bf16.mxu0 %v1471_v22 }
 0x328   :  { %v1335_v13 = vpop.f32.mrb[4].mxu1 }
 0x329   :  { %605 = vrot.lane.b32.xlu1 %v1335_v13, %s1521_s24  ;;  %v520_v16 = vpop.f32.mrb[5].mxu1 }
 0x32a   :  { %603 = vrot.lane.b32.xlu0 %v520_v16, %s1521_s24 }
 0x32c   :  { %v1338_v18 = vpop.f32.mrb[6].mxu1 }
 0x32d   :  { %609 = vrot.lane.b32.xlu1 %v1338_v18, %s1521_s24  ;;  %v530_v19 = vpop.f32.mrb[7].mxu1  ;;  %v1020_v18 = vld [vmem:[%s2004_s9] sm:$0xff] }
 0x330   :  { %v1341_v52 = vpop.f32.mrb[8].mxu1 }
 0x331   :  { %607 = vrot.lane.b32.xlu1 %v530_v19, %s1521_s24  ;;  %v540_v53 = vpop.f32.mrb[9].mxu1  ;;  %v1021_v19 = vld [vmem:[%s2004_s9 + $0x8] sm:$0xff] }
 0x332   :  { %619 = vrot.lane.b32.xlu0 %v540_v53, %s1522_s17  ;;  %v1483_v21 = vpack.c.bf16 %v1021_v19, %v1020_v18  ;;  %v936_v53 = vld [vmem:[%s2003_s8 + $0x8] sm:$0xff] }
 0x334   :  { %v1344_v54 = vpop.f32.mrb[10].mxu1  ;;  %1484 = vmatprep.subr.bf16.mxu1 %v1483_v21 }
 0x335   :  { %621 = vrot.lane.b32.xlu1 %v1341_v52, %s1522_s17  ;;  %v550_v57 = vpop.f32.mrb[11].mxu1  ;;  %v935_v52 = vld [vmem:[%s2003_s8] sm:$0xff]  ;;  %1486 = vmatpush3.bf16.msra.mxu1 %v1483_v21 }
 0x336   :  { %623 = vrot.lane.b32.xlu0 %v550_v57, %s1522_s17  ;;  %v1475_v55 = vpack.c.bf16 %v936_v53, %v935_v52 }
 0x338   :  { %v1347_v59 = vpop.f32.mrb[12].mxu1 }
 0x339   :  { %625 = vrot.lane.b32.xlu1 %v1344_v54, %s1522_s17  ;;  %v560_v60 = vpop.f32.mrb[13].mxu1  ;;  %v1487_v54 = vpack.c.bf16 %v1023_v51, %v1022_v20 }
 0x33a   :  { %635 = vrot.lane.b32.xlu0 %v560_v60, %s1523_s18 }
 0x33b   :  { %1488 = vmatprep.subr.bf16.mxu1 %v1487_v54 }
 0x33c   :  { %v1350_v61 = vpop.f32.mrb[14].mxu1  ;;  %1490 = vmatpush3.bf16.msra.mxu1 %v1487_v54 }
 0x33d   :  { %637 = vrot.lane.b32.xlu1 %v1347_v59, %s1523_s18  ;;  %v570_v62 = vpop.f32.mrb[15].mxu1 }
 0x33e   :  { %639 = vrot.lane.b32.xlu0 %v570_v62, %s1523_s18  ;;  %v938_v62 = vld [vmem:[%s2003_s8 + $0x18] sm:$0xff] }
 0x340   :  { %v1353_v6 = vpop.f32.mrb[16].mxu1 }
 0x341   :  { %641 = vrot.lane.b32.xlu1 %v1350_v61, %s1523_s18  ;;  %v580_v23 = vpop.f32.mrb[17].mxu1  ;;  %v937_v61 = vld [vmem:[%s2003_s8 + $0x10] sm:$0xff] }
 0x342   :  { %653 = vrot.lane.b32.xlu0 %v1353_v6, %s1524_s2  ;;  %v1479_v63 = vpack.c.bf16 %v938_v62, %v937_v61 }
 0x344   :  { %v1356_v24 = vpop.f32.mrb[18].mxu1 }
 0x345   :  { %657 = vrot.lane.b32.xlu1 %v1356_v24, %s1524_s2  ;;  %v590_v25 = vpop.f32.mrb[19].mxu1 }
 0x346   :  { %651 = vrot.lane.b32.xlu0 %v580_v23, %s1524_s2 }
 0x34a   :  { %655 = vrot.lane.b32.xlu0 %v590_v25, %s1524_s2 }
 0x39b   :  { %v606_v26 = vpop.permute.xlu1 %605 }
 0x39c   :  { %v604_v28 = vpop.permute.xlu0 %603  ;;  %v664_v37 = vsel %vm316_vm1, %v451_v42, %v606_v26 }
 0x39d   :  { %v663_v2 = vsel %vm316_vm1, %v450_v43, %v604_v28 }
 0x39f   :  { %v610_v27 = vpop.permute.xlu1 %609 }
 0x3a0   :  { %v666_v39 = vsel %vm316_vm1, %v453_v48, %v610_v27 }
 0x3a3   :  { %v608_v29 = vpop.permute.xlu1 %607 }
 0x3a4   :  { %v620_v0 = vpop.permute.xlu0 %619  ;;  %v665_v41 = vsel %vm316_vm1, %v452_v49, %v608_v29 }
 0x3a5   :  { %v667_v4 = vsel %vm58_vm0, %v663_v2, %v620_v0 }
 0x3a7   :  { %v622_v1 = vpop.permute.xlu1 %621 }
 0x3a8   :  { %v624_v30 = vpop.permute.xlu0 %623  ;;  %v668_v38 = vsel %vm58_vm0, %v664_v37, %v622_v1 }
 0x3a9   :  { %v669_v42 = vsel %vm58_vm0, %v665_v41, %v624_v30 }
 0x3ab   :  { %v626_v31 = vpop.permute.xlu1 %625 }
 0x3ac   :  { %v636_v32 = vpop.permute.xlu0 %635  ;;  %v670_v7 = vsel %vm58_vm0, %v666_v39, %v626_v31 }
 0x3ad   :  { %v671_v40 = vsel %vm325_vm2, %v667_v4, %v636_v32 }
 0x3af   :  { %v638_v33 = vpop.permute.xlu1 %637 }
 0x3b0   :  { %v640_v34 = vpop.permute.xlu0 %639  ;;  %v672_v46 = vsel %vm325_vm2, %v668_v38, %v638_v33 }
 0x3b1   :  { %v673_v8 = vsel %vm325_vm2, %v669_v42, %v640_v34 }
 0x3b3   :  { %v642_v36 = vpop.permute.xlu1 %641 }
 0x3b4   :  { %v654_v35 = vpop.permute.xlu0 %653  ;;  %v674_v49 = vsel %vm325_vm2, %v670_v7, %v642_v36 }
 0x3b5   :  { %v676_v43 = vsel %vm330_vm3, %v672_v46, %v654_v35 }
 0x3b7   :  { %v658_v50 = vpop.permute.xlu1 %657 }
 0x3b8   :  { %v652_v44 = vpop.permute.xlu0 %651  ;;  %v678_v10 = vsel %vm330_vm3, %v674_v49, %v658_v50 }
 0x3b9   :  { %v675_v5 = vsel %vm330_vm3, %v671_v40, %v652_v44 }
 0x3ba   :  { %1377 = vmatprep.mubr.msk.f32.mxu0 %vm352_vm4, %v675_v5 }
 0x3bb   :  { %1378 = vmatmul.mubr.msk.f32.vlgmr.msra.gmra.mrb[16].mxu0 %vm352_vm4, %v676_v43 }
 0x3bc   :  { %v656_v47 = vpop.permute.xlu0 %655  ;;  %1474 = vmatpush3.bf16.msra.mxu0 %v1471_v22 }
 0x3bd   :  { %v677_v9 = vsel %vm330_vm3, %v673_v8, %v656_v47  ;;  %1476 = vmatprep.subr.bf16.mxu0 %v1475_v55 }
 0x3be   :  { %1380 = vmatprep.mubr.msk.f32.mxu0 %vm352_vm4, %v677_v9 }
 0x3bf   :  { %1381 = vmatmul.mubr.msk.f32.gmra.mrb[18].mxu0 %vm352_vm4, %v678_v10 }
 0x48e   :  { %v1379_v48 = vpop.f32.mrb[16].mxu0 }
 0x48f   :  { %v774_v11 = vpop.f32.mrb[17].mxu0  ;;  %v780_v13 = vadd.f32 %v1379_v48, %v1167_v45 }
 0x490   :  { %v775_v12 = vadd.f32 %v1167_v45, %v774_v11 }
 0x492   :  { %v1382_v14 = vpop.f32.mrb[18].mxu0  ;;  %1387 = vmatprep.mubr.msk.f32.mxu0 %vm316_vm1, %v775_v12 }
 0x493   :  { %v784_v15 = vpop.f32.mrb[19].mxu0  ;;  %1388 = vmatmul.mubr.msk.f32.vlgmr.msra.gmra.mrb[20].mxu0 %vm316_vm1, %v780_v13  ;;  %v790_v17 = vadd.f32 %v1382_v14, %v1167_v45 }
 0x494   :  { %v785_v16 = vadd.f32 %v1167_v45, %v784_v15  ;;  %1478 = vmatpush3.bf16.msra.mxu0 %v1475_v55 }
 0x495   :  { %1480 = vmatprep.subr.bf16.mxu0 %v1479_v63 }
 0x496   :  { %1390 = vmatprep.mubr.msk.f32.mxu0 %vm316_vm1, %v785_v16 }
 0x497   :  { %1391 = vmatmul.mubr.msk.f32.gmra.mrb[22].mxu0 %vm316_vm1, %v790_v17 }
 0x498   :  { %1482 = vmatpush3.bf16.msra.mxu0 %v1479_v63 }
 0x566   :  { %v1389_v57 = vpop.f32.mrb[20].mxu0 }
 0x567   :  { %v886_v58 = vadd.f32 %v1389_v57, %v1172_v56  ;;  %v880_v59 = vpop.f32.mrb[21].mxu0 }
 0x568   :  { %v881_v60 = vadd.f32 %v1172_v56, %v880_v59 }
 0x569   :  { %900 = vst.msk [vmem:[%s2006_s11 + $0x8] sm:$0xff] %vm316_vm1, %v886_v58 }
 0x56a   :  { %899 = vst.msk [vmem:[%s2006_s11] sm:$0xff] %vm316_vm1, %v881_v60  ;;  %903 = vxpose.xlu0.b32.start [1/4] (short) (narrow) %v881_v60, 16  ;;  %v1392_v3 = vpop.f32.mrb[22].mxu0 }
 0x56b   :  { %v896_v6 = vadd.f32 %v1392_v3, %v1172_v56  ;;  %v890_v22 = vpop.f32.mrb[23].mxu0 }
 0x56c   :  { %v891_v23 = vadd.f32 %v1172_v56, %v890_v22 }
 0x56d   :  { %902 = vst.msk [vmem:[%s2006_s11 + $0x18] sm:$0xff] %vm316_vm1, %v896_v6 }
 0x56e   :  { %901 = vst.msk [vmem:[%s2006_s11 + $0x10] sm:$0xff] %vm316_vm1, %v891_v23  ;;  %904 = vxpose.xlu0.b32.cont [2/4] (short) (narrow) %v886_v58, 16  ;;  %s1525_s11 = smov [#allocation2]  }
 0x56f   :  { %s1118_s22 = sshll.u32 %s1525_s11, 4  ;;  %s1119_s22 = int_to_ptr.vmem [resolvable:$true] %s1118_s22 }
 0x570   :  { %s1497_s6 = scalar_lea.vmem %s1119_s22, 16  ;;  %s1501_s17 = scalar_lea.vmem %s1119_s22, 32 }
 0x571   :  { %p1498_p0 = scmp.ne.s32.totalorder %s1119_s22, %s1497_s6  ;;  %p1502_p1 = scmp.lt.s32.totalorder %s1119_s22, %s1119_s22 }
 0x572   :  { %905 = vxpose.xlu0.b32.cont [3/4] (short) (narrow) %v891_v23, 16  ;;  %p1503_p2 = scmp.lt.s32.totalorder %s1501_s17, %s1497_s6 }
 0x574   :  { %p1504_p3 = por %p1503_p2, %p1502_p1 }
 0x576   :  { %906 = vxpose.xlu0.b32.end [4/4] (short) (narrow) %v896_v6, 16  ;;  %p1505_p4 = pnand %p1504_p3, %p1498_p0 }
 0x5ea   :  { %v919_v24 = vpop.trf.xlu0 }
 0x5eb   :  { %1401 = vmatprep.mubr.msk.f32.mxu0 %vm58_vm0, %v919_v24  ;;  %1412 = vmatprep.mubr.msk.f32.mxu1 %vm58_vm0, %v919_v24 }
 0x5ee   :  { %v920_v25 = vpop.trf.xlu0 }
 0x5ef   :  { %1402 = vmatmul.mubr.msk.f32.vlgmr.msra.gmra.mrb[24].mxu0 %vm58_vm0, %v920_v25  ;;  %1413 = vmatmul.mubr.msk.f32.vlgmr.msra.gmra.mrb[20].mxu1 %vm58_vm0, %v920_v25 }
 0x6c2   :  { %v1403_v26 = vpop.f32.mrb[24].mxu0  ;;  %v1414_v27 = vpop.f32.mrb[20].mxu1 }
 0x6c3   :  { %v1100_v28 = vmul.f32 %v1414_v27, %v1403_v26  ;;  %v1011_v29 = vpop.f32.mrb[25].mxu0  ;;  %v1090_v0 = vpop.f32.mrb[21].mxu1 }
 0x6c4   :  { %v1099_v1 = vmul.f32 %v1090_v0, %v1011_v29 }
 0x6c5   :  { %v1102_v30 = vsel %vm316_vm1, %v1100_v28, 0.0 }
 0x6c6   :  { %v1101_v31 = vsel %vm316_vm1, %v1099_v1, 0.0 }
 0x6c7   :  { %v1103_v32 = vadd.f32 %v1102_v30, %v1101_v31 }
 0x6c9   :  { %v1104_v33 = vrot.slane %v1103_v32, 4 }
 0x6cb   :  { %v1105_v34 = vadd.f32 %v1104_v33, %v1103_v32 }
 0x6cd   :  { %v1106_v35 = vrot.slane %v1105_v34, 2 }
 0x6cf   :  { %v1107_v36 = vadd.f32 %v1106_v35, %v1105_v34 }
 0x6d1   :  { %v1108_v2 = vrot.slane %v1107_v36, 1 }
 0x6d3   :  { %v1109_v37 = vadd.f32 %v1108_v2, %v1107_v36 }
 0x6d5   :  { %1111 = vst.msk [vmem:[#allocation2] sm:$0x1] %vm1110_vm5, %v1109_v37 }
 0x6d6   :  { %1508 = shalt.err (!%p1505_p4)
}
 0x6d7   :  { %s1509_s5 = scalar_lea.hbm %s2005_s10, 16 }
 0x6d8   :  { %p1510_p5 = scmp.ne.s32.totalorder %s2005_s10, %s1509_s5  ;;  %p1513_p6 = scmp.lt.u32.totalorder %s1509_s5, %s2005_s10 }
 0x6da   :  { %p1515_p7 = pnand %p1513_p6, %p1510_p5 }
 0x6dc   :  { %1518 = shalt.err (!%p1515_p7)
}
 0x6dd   :  { %1121 = dma.vmem_to_hbm [thread:$0]  %s1119_s22, 16, %s2005_s10, [#allocation3]  }
 0x6de   :  { %1519 = dma.done.wait [#allocation3], 16  }
 0x6df   :  { %1520 = vsyncadd [#allocation3], 4294967280 }
 0x6e0   :  { %1129 = vsyncpa [#allocation3], 1 }

</bundles_post_ra>
